<compile_context>
chip_gen: v5e
topology: v5e:2x2
jax: 0.10.0
libtpu: 0.0.40
codegen_flags: <defaults>
</compile_context>

<pallas_src>
import math

import jax
import jax.numpy as jnp
from jax.experimental import pallas as pl
from jax.experimental.pallas import tpu as pltpu


# ----------------------------------------------------------------------------
# pe table construction (replicates the PyTorch __init__ loop exactly,
# including its exponent quirk: cos term uses 2*(i+1)/d_model).
# ----------------------------------------------------------------------------
def _build_pe(d_model: int, max_seq_len: int) -> jnp.ndarray:
    # NOTE: like the PyTorch reference, requires even d_model (writes pe[pos][i+1]).
    pe = [[0.0] * d_model for _ in range(max_seq_len)]
    for pos in range(max_seq_len):
        for i in range(0, d_model, 2):
            pe[pos][i] = math.sin(pos / 10000 ** (2 * i / d_model))
            pe[pos][i + 1] = math.cos(pos / 10000 ** (2 * (i + 1) / d_model))
    return jnp.asarray(pe, dtype=jnp.float32)  # (max_seq_len, d_model)


# ----------------------------------------------------------------------------
# Kernel body: pure VPU elementwise; pe broadcasts over the row (batch) dim.
# ----------------------------------------------------------------------------
def _pos_enc_kernel(x_ref, pe_ref, o_ref, *, scale):
    o_ref[...] = x_ref[...] * scale + pe_ref[...]


# ----------------------------------------------------------------------------
# Block-size selection (byte budget, dtype-aware sublane alignment).
# ----------------------------------------------------------------------------
_TARGET_BLOCK_BYTES = 4 * 1024 * 1024  # ~4 MiB x/out blocks (review target)
_VMEM_LIMIT_BYTES = 32 * 1024 * 1024   # fits every generation's physical VMEM


def _row_block(b: int, itemsize: int) -> int:
    # Sublane packing: f32 -> 8, bf16 -> 16, int8/fp8 -> 32 rows per vreg tile.
    align = 8 * max(1, 4 // itemsize)
    cap = 1024
    if b <= cap:
        return b  # full-extent block is always legal
    return max(align, (cap // align) * align)


def _col_block(n_cols: int, row_blk: int, itemsize: int) -> int:
    budget_elems = max(128, _TARGET_BLOCK_BYTES // max(1, row_blk * itemsize))
    if n_cols <= budget_elems:
        return n_cols  # full-extent block is always legal
    cap = (budget_elems // 128) * 128
    # Prefer a 128-multiple divisor of n_cols so the tail block stays lane-dense.
    for c in range(cap, 0, -128):
        if n_cols % c == 0:
            return c
    return max(128, cap)


# ----------------------------------------------------------------------------
# pallas_call wrapper on the flattened (B, S*D) layout.
# ----------------------------------------------------------------------------
def _positional_encoder_2d(x2d: jnp.ndarray, pe2d: jnp.ndarray, d_model: int) -> jnp.ndarray:
    b, n_cols = x2d.shape
    itemsize = jnp.dtype(x2d.dtype).itemsize
    scale = math.sqrt(float(d_model))

    row_blk = _row_block(b, itemsize)
    col_blk = _col_block(n_cols, row_blk, itemsize)

    grid = (pl.cdiv(n_cols, col_blk), pl.cdiv(b, row_blk))  # (col outer, row inner)

    kernel = lambda x_ref, pe_ref, o_ref: _pos_enc_kernel(x_ref, pe_ref, o_ref, scale=scale)

    return pl.pallas_call(
        kernel,
        out_shape=jax.ShapeDtypeStruct((b, n_cols), x2d.dtype),
        grid=grid,
        in_specs=[
            # x: block index (row, col); col is the outer grid axis, row inner.
            pl.BlockSpec((row_blk, col_blk), lambda c, r: (r, c)),
            # pe: depends only on the column axis -> same block across the inner
            # (row) axis, so it is fetched once per column block.
            pl.BlockSpec((1, col_blk), lambda c, r: (0, c)),
        ],
        out_specs=pl.BlockSpec((row_blk, col_blk), lambda c, r: (r, c)),
        compiler_params=pltpu.CompilerParams(
            dimension_semantics=("parallel", "parallel"),
            vmem_limit_bytes=_VMEM_LIMIT_BYTES,
        ),
    )(x2d, pe2d)


# ----------------------------------------------------------------------------
# Module-like wrapper: builds pe once, caches the per-(seq_len, dtype) flattened
# pe slab so the slice/reshape/cast is not redone every call.
# ----------------------------------------------------------------------------
class PositionalEncoder:
    def __init__(self, d_model: int, max_seq_len: int = 80):
        self.d_model = d_model
        self.max_seq_len = max_seq_len
        self.pe = _build_pe(d_model, max_seq_len)  # (max_seq_len, d_model) f32
        self._pe2d_cache = {}

    def _pe2d(self, seq_len: int, dtype) -> jnp.ndarray:
        key = (seq_len, jnp.dtype(dtype).name)
        if key not in self._pe2d_cache:
            pe2d = self.pe[:seq_len, :].reshape(1, seq_len * self.d_model).astype(dtype)
            self._pe2d_cache[key] = pe2d
        return self._pe2d_cache[key]

    def __call__(self, x: jnp.ndarray) -> jnp.ndarray:
        b, s, d = x.shape
        if d != self.d_model:
            raise ValueError(f"last dim {d} != d_model {self.d_model}")
        if s > self.max_seq_len:
            raise ValueError(f"seq_len {s} > max_seq_len {self.max_seq_len}")
        pe2d = self._pe2d(s, x.dtype)
        x2d = x.reshape(b, s * d)  # lane-dense flattened layout
        out2d = _positional_encoder_2d(x2d, pe2d, d)
        return out2d.reshape(b, s, d)


if __name__ == "__main__":
    d_model = 32
    max_seq_len = 80
    batch, seq = 2, 8

    encoder = PositionalEncoder(d_model, max_seq_len)

    key = jax.random.PRNGKey(0)
    x = jax.random.normal(key, (batch, seq, d_model), dtype=jnp.float32)

    out = encoder(x)
    out = jax.block_until_ready(out)

    # reference check (plain JAX)
    ref = x * math.sqrt(d_model) + encoder.pe[None, :seq, :]
    assert out.shape == (batch, seq, d_model)
    assert jnp.allclose(out, ref, atol=1e-5, rtol=1e-5)

    print("KERNEL_OK")
</pallas_src>

<mosaic_0001>
module attributes {stable_mosaic.version = 11 : i64} {
  func.func @_lambda_(%arg0: i32, %arg1: i32, %arg2: memref<2x256xf32, #tpu.memory_space<vmem>>, %arg3: memref<1x256xf32, #tpu.memory_space<vmem>>, %arg4: memref<2x256xf32, #tpu.memory_space<vmem>>) attributes {dimension_semantics = [#tpu.dimension_semantics<parallel>, #tpu.dimension_semantics<parallel>], iteration_bounds = array<i64: 1, 1>, scalar_prefetch = 0 : i64, scratch_operands = 0 : i64, tpu.core_type = #tpu.core_type<tc>, window_params = [{transform_indices = @transform_0, window_bounds = array<i64: 2, 256>}, {transform_indices = @transform_1, window_bounds = array<i64: 1, 256>}, {transform_indices = @transform_2, window_bounds = array<i64: 2, 256>}]} {
    %c0 = arith.constant 0 : index
    %c0_0 = arith.constant 0 : index
    %0 = vector.load %arg2[%c0, %c0_0] : memref<2x256xf32, #tpu.memory_space<vmem>>, vector<2x256xf32>
    %cst = arith.constant 5.65685415 : f32
    %1 = vector.broadcast %cst : f32 to vector<2x256xf32>
    %2 = arith.mulf %0, %1 : vector<2x256xf32>
    %c0_1 = arith.constant 0 : index
    %c0_2 = arith.constant 0 : index
    %3 = vector.load %arg3[%c0_1, %c0_2] : memref<1x256xf32, #tpu.memory_space<vmem>>, vector<1x256xf32>
    %4 = vector.broadcast %3 : vector<1x256xf32> to vector<2x256xf32>
    %5 = arith.addf %2, %4 : vector<2x256xf32>
    %c0_3 = arith.constant 0 : index
    %c0_4 = arith.constant 0 : index
    %6 = vector.load %arg4[%c0_3, %c0_4] : memref<2x256xf32, #tpu.memory_space<vmem>>, vector<2x256xf32>
    tpu.vector_store %arg4[%c0_3, %c0_4], %5 {strides = array<i32>} : memref<2x256xf32, #tpu.memory_space<vmem>>, vector<2x256xf32>,
    return
  }
  func.func @transform_0(%arg0: i32, %arg1: i32) -> (i32, i32) {
    %c0_i32 = arith.constant 0 : i32
    return %arg1, %arg0 : i32, i32
  }
  func.func @transform_1(%arg0: i32, %arg1: i32) -> (i32, i32) {
    %c0_i32 = arith.constant 0 : i32
    %c0_i32_0 = arith.constant 0 : i32
    return %c0_i32, %arg0 : i32, i32
  }
  func.func @transform_2(%arg0: i32, %arg1: i32) -> (i32, i32) {
    %c0_i32 = arith.constant 0 : i32
    return %arg1, %arg0 : i32, i32
  }
}

</mosaic_0001>

<bundles_post_ra>
// kernel: tpu_custom_call.1
= control target key start
LH: loop header
LB: loop body
LE: loop exit
PB: predicated region body
PF: predicated region fallthrough
CT: control target
= control target key end

     0   :  { %7 = vsyncpa [#allocation3], 0  ;;  %s178_s0 = inlined_call_operand.hbm [shape: f32[2,256], index: 0, kind: input, shape index: {}]   ;;  %s179_s1 = inlined_call_operand.hbm [shape: f32[1,256], index: 1, kind: input, shape index: {}]   ;;  %s180_s2 = inlined_call_operand.hbm [shape: f32[2,256], index: 2, kind: output, shape index: {}]  }
   0x1   :  { %8 = vsyncpa [#allocation6], 0 }
   0x2   :  { %9 = vsyncpa [#allocation4], 0  ;;  %s15_s11 = sshll.u32 %s178_s0, 4  ;;  %s151_s12 = smov [#allocation2]   ;;  %s16_s11 = int_to_ptr.hbm [resolvable:$true] %s15_s11 }
   0x3   :  { %s17_s13 = sshll.u32 %s151_s12, 4  ;;  %s26_s16 = sshll.u32 %s179_s1, 4  ;;  %s18_s13 = int_to_ptr.vmem [resolvable:$true] %s17_s13  ;;  %s27_s16 = int_to_ptr.hbm [resolvable:$true] %s26_s16 }
   0x4   :  { %20 = dma.hbm_to_vmem [thread:$0]  %s16_s11, 64, %s18_s13, [#allocation3]  }
   0x5   :  { %s152_s17 = smov [#allocation5]  }
   0x6   :  { %s28_s18 = sshll.u32 %s152_s17, 4  ;;  %s29_s18 = int_to_ptr.vmem [resolvable:$true] %s28_s18 }
   0x7   :  { %31 = dma.hbm_to_vmem [thread:$0]  %s27_s16, 32, %s29_s18, [#allocation6]  }
   0x8   :  { %145 = dma.done.wait [#allocation3], 64  }
   0x9   :  { %146 = vsyncadd [#allocation3], 4294967232 }
   0xa   :  { %147 = dma.done.wait [#allocation6], 32  }
   0xb   :  { %148 = vsyncadd [#allocation6], 4294967264  ;;  %v40_v0 = vld [vmem:[#allocation2] sm:$0xf]  ;;  %v42_v1 = vld [vmem:[#allocation5] sm:$0x3] }
   0xc   :  { %v44_v2 = vperm.slane %v42_v1, 0  ;;  %v45_v3 = vperm.slane %v42_v1, 1  ;;  %v41_v4 = vmul.f32 5.656854, %v40_v0  ;;  %vm47_vm0 = vcmask 1041408   ;;  %s153_s0 = smov [#allocation7]  }
   0xd   :  { %s57_s19 = sshll.u32 %s153_s0, 4  ;;  %s59_s21 = sshll.u32 %s180_s2, 4  ;;  %s58_s19 = int_to_ptr.vmem [resolvable:$true] %s57_s19  ;;  %s60_s21 = int_to_ptr.hbm [resolvable:$true] %s59_s21 }
   0xe   :  { %v46_v5 = vrot.slane %v45_v3, 6 }
  0x10   :  { %v48_v6 = vsel %vm47_vm0, %v44_v2, %v46_v5 }
  0x11   :  { %v50_v7 = vadd.f32 %v48_v6, %v41_v4 }
  0x13   :  { %51 = vst [vmem:[#allocation7] sm:$0xf] %v50_v7 }
  0x14   :  { %62 = dma.vmem_to_hbm [thread:$0]  %s58_s19, 64, %s60_s21, [#allocation4]  }
  0x15   :  { %149 = dma.done.wait [#allocation4], 64  }
  0x16   :  { %150 = vsyncadd [#allocation4], 4294967232 }
  0x17   :  { %67 = vsyncpa [#allocation3], 1 }
  0x18   :  { %68 = vsyncpa [#allocation6], 1 }
  0x19   :  { %69 = vsyncpa [#allocation4], 1 }

</bundles_post_ra>
